<compile_context>
chip_gen: v6e
topology: v6e:2x2x1
jax: 0.10.0
libtpu: 0.0.40
codegen_flags: <defaults>
</compile_context>

<pallas_src>
import jax
import jax.numpy as jnp
import numpy as np
from jax.experimental import pallas as pl
from jax.experimental.pallas import tpu as pltpu


# ----------------------------------------------------------------------------
# Pallas kernel
# ----------------------------------------------------------------------------
def _fql_mixer_kernel(x_ref, q_ref, act_ref, wv_ref, bv_ref, wu_ref, bu_ref,
                      kidx_ref, sel_ref, m_ref, out_ref):
    """One grid step processes `tile_lanes` batch columns (batch = lane axis).

    x_ref   : (Dx, L)  f32   de-replicated MLP inputs^T (state once + per-agent local)
    q_ref   : (AN, L)  f32   per-agent Q values^T       (AN = n_agents * n_actions)
    act_ref : (A,  L)  int32 taken-action index per agent^T
    wv_ref  : (AN, Dx) f32   collapsed + packed V weights (transposed)
    bv_ref  : (AN, 1)  f32   V bias with agent-id contribution folded in
    wu_ref  : (AN, Dx) f32   same for U
    bu_ref  : (AN, 1)  f32
    kidx_ref: (AN, 1)  f32   row r -> action index (r % n_actions)
    sel_ref : (AN, A)  f32   row r -> agent selector (1 at column r // n_actions)
    m_ref   : (AN, AN) f32   fql_lambda * (J - kron(I_A, J_nact))
    out_ref : (AN, L)  f32   q_tot^T
    """
    x = x_ref[...]
    # Per-agent V / U outputs for every batch column: two small MXU matmuls
    # (kept separate so no unaligned sublane split of a fused result).
    v = jnp.dot(wv_ref[...], x, preferred_element_type=jnp.float32) + bv_ref[...]
    u = jnp.dot(wu_ref[...], x, preferred_element_type=jnp.float32) + bu_ref[...]

    # th.gather(u, index=actions): expand the int32 action-per-agent stream to
    # one value per (agent, action) row and mask.  Values are small integers,
    # exactly representable in f32, so the equality compare is exact.
    act_rows = jnp.dot(sel_ref[...], act_ref[...].astype(jnp.float32),
                       preferred_element_type=jnp.float32)        # (AN, L)
    u_taken = jnp.where(act_rows == kidx_ref[...], u, 0.0)        # (AN, L)

    # "sum over the OTHER agents" with fql_lambda already folded into m_ref:
    # others[a*nA+k, b] = lam * sum_{a' != a} u[a', act(a', b), b]
    others = jnp.dot(m_ref[...], u_taken, preferred_element_type=jnp.float32)

    # q_tot = q + lam*(A-1) * v * ((sum - own)/(A-1))  ==  q + v * others
    out_ref[...] = q_ref[...] + v * others


# ----------------------------------------------------------------------------
# Tiling helpers
# ----------------------------------------------------------------------------
def _num_tensorcores():
    """Best-effort TensorCore count (2 on v7x-style parts, else 1)."""
    try:
        info = pltpu.get_tpu_info()
    except Exception:
        return 1
    for name in ("num_cores", "core_count", "num_tensorcores", "tensor_cores"):
        v = getattr(info, name, None)
        if isinstance(v, int) and v > 0:
            return v
    return 1


def _choose_lane_tiling(B, requested_tile, num_cores):
    """Pick (padded_B, lane_tile, grid): lane_tile is a multiple of 128 (or the
    full batch extent) and divides padded_B exactly, so there are no big
    jnp.pad copies and no interior masked stores."""
    LANE = 128
    requested_tile = max(LANE, (int(requested_tile) // LANE) * LANE)
    if B <= requested_tile:
        # Whole batch fits in one tile.  On 2-TensorCore parts split it into
        # two equal lane-aligned halves so both cores get work; on single-TC
        # chips (v5e/v6e) a forced split is pure per-step overhead.
        if num_cores >= 2 and B % (2 * LANE) == 0:
            return B, B // 2, 2
        return B, B, 1
    B_pad = -(-B // LANE) * LANE                   # pad only to next 128 lanes
    n = B_pad // LANE
    max_d = requested_tile // LANE
    divs = [d for d in range(1, n + 1) if n % d == 0 and d <= max_d]
    best = max(divs)
    if num_cores >= 2:
        even = [d for d in divs if (n // d) % 2 == 0]
        if even:
            best = max(even)                       # even grid -> equal TC work
    tile = best * LANE
    return B_pad, tile, B_pad // tile


# ----------------------------------------------------------------------------
# Wrapper
# ----------------------------------------------------------------------------
def fql_mixer_pallas(state, obs, last_actions_oh, actions, q_agents, params,
                     *, fql_lambda, tile_lanes=4096):
    """Forward pass of FQLCriticMixer (t=None path) on flattened (bs*T) rows.

    state           : (B, Ds)          f32
    obs             : (B, A, Do)       f32
    last_actions_oh : (B, A, n_act)    f32   (shifted one-hot, part of the MLP input)
    actions         : (B, A)           int   (taken actions, used for the gather)
    q_agents        : (B, A, n_act)    f32
    Returns q_tot   : (B, A, n_act)    f32
    """
    B, Ds = state.shape
    _, A, Do = obs.shape
    n_act = q_agents.shape[-1]
    Dl = Do + n_act                      # per-agent "local" features
    Dx = Ds + A * Dl                     # de-replicated input width
    AN = A * n_act
    hp = jax.lax.Precision.HIGHEST

    (wv1, bv1, wv2, bv2, wv3, bv3, wu1, bu1, wu2, bu2, wu3, bu3) = params

    # --- collapse each activation-free 3-layer stack to one linear (exact) ---
    def collapse(w1, b1, w2, b2, w3, b3):
        w_eff = jnp.dot(jnp.dot(w1, w2, precision=hp), w3, precision=hp)   # (D, n_act)
        b_eff = (jnp.dot(jnp.dot(b1, w2, precision=hp), w3, precision=hp)
                 + jnp.dot(b2, w3, precision=hp) + b3)                     # (1, n_act)
        return w_eff, b_eff

    wv_eff, bv_eff = collapse(wv1, bv1, wv2, bv2, wv3, bv3)
    wu_eff, bu_eff = collapse(wu1, bu1, wu2, bu2, wu3, bu3)

    eye_a = jnp.eye(A, dtype=jnp.float32)

    # Input column layout of the original MLP: [state | obs | last_actions | agent_id]
    def pack(w_eff, b_eff):
        w_s = w_eff[:Ds]                    # shared state rows (same for all agents)
        w_l = w_eff[Ds:Ds + Dl]             # per-agent obs + last-action rows
        w_id = w_eff[Ds + Dl:]              # agent-id one-hot rows -> constant per agent
        w_t = jnp.concatenate([jnp.tile(w_s.T, (A, 1)),           # (AN, Ds)
                               jnp.kron(eye_a, w_l.T)], axis=1)   # (AN, A*Dl)
        b = (b_eff + w_id).reshape(AN, 1)                         # agent-id folded in
        return w_t.astype(jnp.float32), b.astype(jnp.float32)

    wv_t, bv = pack(wv_eff, bv_eff)
    wu_t, bu = pack(wu_eff, bu_eff)

    # Constant per-row action index and row->agent selector (for the gather mask).
    kidx = (jnp.arange(AN, dtype=jnp.float32) % n_act).reshape(AN, 1)
    sel = jnp.kron(eye_a, jnp.ones((n_act, 1), jnp.float32))               # (AN, A)
    # Agent mixing matrix with fql_lambda folded in: others = m_mix @ u_taken.
    m_mix = fql_lambda * (jnp.ones((AN, AN), jnp.float32)
                          - jnp.kron(eye_a, jnp.ones((n_act, n_act), jnp.float32)))

    # --- lane-dense (batch-as-lanes) streams; state streamed once per row ---
    local = jnp.concatenate([obs, last_actions_oh], axis=-1).reshape(B, A * Dl)
    x_t = jnp.concatenate([state, local], axis=1).astype(jnp.float32).T    # (Dx, B)
    q_t = q_agents.reshape(B, AN).astype(jnp.float32).T                    # (AN, B)
    act_t = actions.astype(jnp.int32).T                                    # (A,  B)

    B_pad, tile, grid = _choose_lane_tiling(B, tile_lanes, _num_tensorcores())
    pad = B_pad - B
    if pad:                                   # at most 127 lanes, only when tiled
        x_t = jnp.pad(x_t, ((0, 0), (0, pad)))
        q_t = jnp.pad(q_t, ((0, 0), (0, pad)))
        act_t = jnp.pad(act_t, ((0, 0), (0, pad)))

    def stream_spec(rows):
        return pl.BlockSpec((rows, tile), lambda i: (0, i))

    def const_spec(arr):
        return pl.BlockSpec(arr.shape, lambda i: (0, 0))

    out = pl.pallas_call(
        _fql_mixer_kernel,
        out_shape=jax.ShapeDtypeStruct((AN, B_pad), jnp.float32),
        grid=(grid,),
        in_specs=[stream_spec(Dx),            # x^T
                  stream_spec(AN),            # q^T
                  stream_spec(A),             # actions^T (int32)
                  const_spec(wv_t), const_spec(bv),
                  const_spec(wu_t), const_spec(bu),
                  const_spec(kidx), const_spec(sel), const_spec(m_mix)],
        out_specs=stream_spec(AN),
        compiler_params=pltpu.CompilerParams(
            dimension_semantics=("parallel",)),
    )(x_t, q_t, act_t, wv_t, bv, wu_t, bu, kidx, sel, m_mix)

    return out[:, :B].T.reshape(B, A, n_act)


# ----------------------------------------------------------------------------
# Plain-JAX glue: _build_inputs equivalent (t=None path, full sequence)
# ----------------------------------------------------------------------------
def build_inputs(state, obs, actions_onehot, n_agents):
    bs, max_t, _ = state.shape
    state_rep = jnp.broadcast_to(state[:, :, None, :],
                                 (bs, max_t, n_agents, state.shape[-1]))
    last_actions = jnp.concatenate(
        [jnp.zeros_like(actions_onehot[:, 0:1]), actions_onehot[:, :-1]], axis=1)
    agent_ids = jnp.broadcast_to(jnp.eye(n_agents, dtype=state.dtype)[None, None],
                                 (bs, max_t, n_agents, n_agents))
    return jnp.concatenate([state_rep, obs, last_actions, agent_ids], axis=-1)


# ----------------------------------------------------------------------------
# Pure-JAX reference (layer-by-layer, matches the PyTorch module)
# ----------------------------------------------------------------------------
def reference_forward(q_agents, inputs, actions, params, *, n_agents, fql_lambda):
    hp = jax.lax.Precision.HIGHEST
    (wv1, bv1, wv2, bv2, wv3, bv3, wu1, bu1, wu2, bu2, wu3, bu3) = params

    def mlp(x, w1, b1, w2, b2, w3, b3):
        h = jnp.matmul(x, w1, precision=hp) + b1
        h = jnp.matmul(h, w2, precision=hp) + b2
        return jnp.matmul(h, w3, precision=hp) + b3

    v = mlp(inputs, wv1, bv1[0], wv2, bv2[0], wv3, bv3[0])
    u = mlp(inputs, wu1, bu1[0], wu2, bu2[0], wu3, bu3[0])
    u_taken = jnp.take_along_axis(u, actions[..., None], axis=-1)[..., 0]
    u_sum = jnp.sum(u_taken, axis=-1, keepdims=True)
    u_final = (u_sum - u_taken) / (n_agents - 1)
    return q_agents + fql_lambda * (n_agents - 1) * v * u_final[..., None]


# ----------------------------------------------------------------------------
# Main
# ----------------------------------------------------------------------------
if __name__ == "__main__":
    def run_case(bs, max_t, tile_lanes, key):
        n_agents, n_actions = 3, 5
        state_dim, obs_dim = 12, 10
        fql_lambda = 0.5
        input_dim = state_dim + obs_dim + n_actions + n_agents   # _get_input_shape

        ks = jax.random.split(key, 24)
        state = jax.random.normal(ks[0], (bs, max_t, state_dim), jnp.float32)
        obs = jax.random.normal(ks[1], (bs, max_t, n_agents, obs_dim), jnp.float32)
        actions = jax.random.randint(ks[2], (bs, max_t, n_agents), 0, n_actions)
        actions_oh = jax.nn.one_hot(actions, n_actions, dtype=jnp.float32)
        q_agents = jax.random.normal(ks[3], (bs, max_t, n_agents, n_actions),
                                     jnp.float32)

        # Deterministic parameter init (nn.Linear-style uniform)
        def linear_params(kw, kb, fan_in, fan_out):
            bound = 1.0 / np.sqrt(fan_in)
            w = jax.random.uniform(kw, (fan_in, fan_out), jnp.float32, -bound, bound)
            b = jax.random.uniform(kb, (1, fan_out), jnp.float32, -bound, bound)
            return w, b

        dims = [(input_dim, 128), (128, 128), (128, n_actions)]
        params, ki = [], 4
        for _net in range(2):              # V then U
            for (fi, fo) in dims:
                w, b = linear_params(ks[ki], ks[ki + 1], fi, fo)
                params += [w, b]
                ki += 2
        params = tuple(params)

        # Glue (plain JAX): shifted last-actions, flatten (bs, T) -> B
        last_actions = jnp.concatenate(
            [jnp.zeros_like(actions_oh[:, 0:1]), actions_oh[:, :-1]], axis=1)
        B = bs * max_t
        out = fql_mixer_pallas(
            state.reshape(B, state_dim),
            obs.reshape(B, n_agents, obs_dim),
            last_actions.reshape(B, n_agents, n_actions),
            actions.reshape(B, n_agents).astype(jnp.int32),
            q_agents.reshape(B, n_agents, n_actions),
            params, fql_lambda=fql_lambda, tile_lanes=tile_lanes)
        out = jax.block_until_ready(out)
        q_tot = out.reshape(bs, max_t, n_agents, n_actions)

        # Correctness vs. pure-JAX layer-by-layer reference
        mlp_inputs = build_inputs(state, obs, actions_oh, n_agents)
        ref = reference_forward(q_agents, mlp_inputs, actions, params,
                                n_agents=n_agents, fql_lambda=fql_lambda)
        np.testing.assert_allclose(np.asarray(q_tot), np.asarray(ref),
                                   rtol=1e-4, atol=1e-4)

    key = jax.random.PRNGKey(0)
    k1, k2 = jax.random.split(key)
    # Case A: tiny batch -> single full-extent lane block (no padding).
    run_case(bs=2, max_t=8, tile_lanes=4096, key=k1)
    # Case B: 256 rows with a forced 128-lane tile -> multi-step grid path.
    run_case(bs=4, max_t=64, tile_lanes=128, key=k2)
    print("KERNEL_OK")
</pallas_src>

<mosaic_0001>
module attributes {stable_mosaic.version = 11 : i64} {
  func.func @_fql_mixer_kernel(%arg0: i32, %arg1: memref<57x16xf32, #tpu.memory_space<vmem>>, %arg2: memref<15x16xf32, #tpu.memory_space<vmem>>, %arg3: memref<3x16xi32, #tpu.memory_space<vmem>>, %arg4: memref<15x57xf32, #tpu.memory_space<vmem>>, %arg5: memref<15x1xf32, #tpu.memory_space<vmem>>, %arg6: memref<15x57xf32, #tpu.memory_space<vmem>>, %arg7: memref<15x1xf32, #tpu.memory_space<vmem>>, %arg8: memref<15x1xf32, #tpu.memory_space<vmem>>, %arg9: memref<15x3xf32, #tpu.memory_space<vmem>>, %arg10: memref<15x15xf32, #tpu.memory_space<vmem>>, %arg11: memref<15x16xf32, #tpu.memory_space<vmem>>) attributes {dimension_semantics = [#tpu.dimension_semantics<parallel>], iteration_bounds = array<i64: 1>, scalar_prefetch = 0 : i64, scratch_operands = 0 : i64, tpu.core_type = #tpu.core_type<tc>, window_params = [{transform_indices = @transform_0, window_bounds = array<i64: 57, 16>}, {transform_indices = @transform_1, window_bounds = array<i64: 15, 16>}, {transform_indices = @transform_2, window_bounds = array<i64: 3, 16>}, {pipeline_mode = #tpu.pipeline_mode<synchronous>, transform_indices = @transform_3, window_bounds = array<i64: 15, 57>}, {pipeline_mode = #tpu.pipeline_mode<synchronous>, transform_indices = @transform_4, window_bounds = array<i64: 15, 1>}, {pipeline_mode = #tpu.pipeline_mode<synchronous>, transform_indices = @transform_5, window_bounds = array<i64: 15, 57>}, {pipeline_mode = #tpu.pipeline_mode<synchronous>, transform_indices = @transform_6, window_bounds = array<i64: 15, 1>}, {pipeline_mode = #tpu.pipeline_mode<synchronous>, transform_indices = @transform_7, window_bounds = array<i64: 15, 1>}, {pipeline_mode = #tpu.pipeline_mode<synchronous>, transform_indices = @transform_8, window_bounds = array<i64: 15, 3>}, {pipeline_mode = #tpu.pipeline_mode<synchronous>, transform_indices = @transform_9, window_bounds = array<i64: 15, 15>}, {transform_indices = @transform_10, window_bounds = array<i64: 15, 16>}]} {
    %c0 = arith.constant 0 : index
    %c0_0 = arith.constant 0 : index
    %0 = vector.load %arg1[%c0, %c0_0] : memref<57x16xf32, #tpu.memory_space<vmem>>, vector<57x16xf32>
    %c0_1 = arith.constant 0 : index
    %c0_2 = arith.constant 0 : index
    %1 = vector.load %arg4[%c0_1, %c0_2] : memref<15x57xf32, #tpu.memory_space<vmem>>, vector<15x57xf32>
    %cst = arith.constant dense<0.000000e+00> : vector<15x16xf32>
    %2 = tpu.matmul %1, %0, %cst {dimension_numbers = #tpu.dot_dimension_numbers<[1], [0], [0], [1], [0, 0, 1, 1], [], []>} : vector<15x57xf32>, vector<57x16xf32>, vector<15x16xf32> -> vector<15x16xf32>
    %c0_3 = arith.constant 0 : index
    %c0_4 = arith.constant 0 : index
    %3 = vector.load %arg5[%c0_3, %c0_4] : memref<15x1xf32, #tpu.memory_space<vmem>>, vector<15x1xf32>
    %4 = vector.broadcast %3 : vector<15x1xf32> to vector<15x16xf32>
    %5 = arith.addf %2, %4 : vector<15x16xf32>
    %c0_5 = arith.constant 0 : index
    %c0_6 = arith.constant 0 : index
    %6 = vector.load %arg6[%c0_5, %c0_6] : memref<15x57xf32, #tpu.memory_space<vmem>>, vector<15x57xf32>
    %cst_7 = arith.constant dense<0.000000e+00> : vector<15x16xf32>
    %7 = tpu.matmul %6, %0, %cst_7 {dimension_numbers = #tpu.dot_dimension_numbers<[1], [0], [0], [1], [0, 0, 1, 1], [], []>} : vector<15x57xf32>, vector<57x16xf32>, vector<15x16xf32> -> vector<15x16xf32>
    %c0_8 = arith.constant 0 : index
    %c0_9 = arith.constant 0 : index
    %8 = vector.load %arg7[%c0_8, %c0_9] : memref<15x1xf32, #tpu.memory_space<vmem>>, vector<15x1xf32>
    %9 = vector.broadcast %8 : vector<15x1xf32> to vector<15x16xf32>
    %10 = arith.addf %7, %9 : vector<15x16xf32>
    %c0_10 = arith.constant 0 : index
    %c0_11 = arith.constant 0 : index
    %11 = vector.load %arg9[%c0_10, %c0_11] : memref<15x3xf32, #tpu.memory_space<vmem>>, vector<15x3xf32>
    %c0_12 = arith.constant 0 : index
    %c0_13 = arith.constant 0 : index
    %12 = vector.load %arg3[%c0_12, %c0_13] : memref<3x16xi32, #tpu.memory_space<vmem>>, vector<3x16xi32>
    %13 = arith.sitofp %12 : vector<3x16xi32> to vector<3x16xf32>
    %cst_14 = arith.constant dense<0.000000e+00> : vector<15x16xf32>
    %14 = tpu.matmul %11, %13, %cst_14 {dimension_numbers = #tpu.dot_dimension_numbers<[1], [0], [0], [1], [0, 0, 1, 1], [], []>} : vector<15x3xf32>, vector<3x16xf32>, vector<15x16xf32> -> vector<15x16xf32>
    %c0_15 = arith.constant 0 : index
    %c0_16 = arith.constant 0 : index
    %15 = vector.load %arg8[%c0_15, %c0_16] : memref<15x1xf32, #tpu.memory_space<vmem>>, vector<15x1xf32>
    %16 = vector.broadcast %15 : vector<15x1xf32> to vector<15x16xf32>
    %17 = arith.cmpf oeq, %14, %16 : vector<15x16xf32>
    %cst_17 = arith.constant 0.000000e+00 : f32
    %18 = vector.broadcast %cst_17 : f32 to vector<15x16xf32>
    %19 = arith.select %17, %10, %18 : vector<15x16xi1>, vector<15x16xf32>
    %c0_18 = arith.constant 0 : index
    %c0_19 = arith.constant 0 : index
    %20 = vector.load %arg10[%c0_18, %c0_19] : memref<15x15xf32, #tpu.memory_space<vmem>>, vector<15x15xf32>
    %cst_20 = arith.constant dense<0.000000e+00> : vector<15x16xf32>
    %21 = tpu.matmul %20, %19, %cst_20 {dimension_numbers = #tpu.dot_dimension_numbers<[1], [0], [0], [1], [0, 0, 1, 1], [], []>} : vector<15x15xf32>, vector<15x16xf32>, vector<15x16xf32> -> vector<15x16xf32>
    %c0_21 = arith.constant 0 : index
    %c0_22 = arith.constant 0 : index
    %22 = vector.load %arg2[%c0_21, %c0_22] : memref<15x16xf32, #tpu.memory_space<vmem>>, vector<15x16xf32>
    %23 = arith.mulf %5, %21 : vector<15x16xf32>
    %24 = arith.addf %22, %23 : vector<15x16xf32>
    %c0_23 = arith.constant 0 : index
    %c0_24 = arith.constant 0 : index
    %25 = vector.load %arg11[%c0_23, %c0_24] : memref<15x16xf32, #tpu.memory_space<vmem>>, vector<15x16xf32>
    tpu.vector_store %arg11[%c0_23, %c0_24], %24 {strides = array<i32>} : memref<15x16xf32, #tpu.memory_space<vmem>>, vector<15x16xf32>,
    return
  }
  func.func @transform_0(%arg0: i32) -> (i32, i32) {
    %c0_i32 = arith.constant 0 : i32
    %c0_i32_0 = arith.constant 0 : i32
    return %c0_i32, %arg0 : i32, i32
  }
  func.func @transform_1(%arg0: i32) -> (i32, i32) {
    %c0_i32 = arith.constant 0 : i32
    %c0_i32_0 = arith.constant 0 : i32
    return %c0_i32, %arg0 : i32, i32
  }
  func.func @transform_2(%arg0: i32) -> (i32, i32) {
    %c0_i32 = arith.constant 0 : i32
    %c0_i32_0 = arith.constant 0 : i32
    return %c0_i32, %arg0 : i32, i32
  }
  func.func @transform_3(%arg0: i32) -> (i32, i32) {
    %c0_i32 = arith.constant 0 : i32
    %c0_i32_0 = arith.constant 0 : i32
    %c0_i32_1 = arith.constant 0 : i32
    return %c0_i32, %c0_i32_0 : i32, i32
  }
  func.func @transform_4(%arg0: i32) -> (i32, i32) {
    %c0_i32 = arith.constant 0 : i32
    %c0_i32_0 = arith.constant 0 : i32
    %c0_i32_1 = arith.constant 0 : i32
    return %c0_i32, %c0_i32_0 : i32, i32
  }
  func.func @transform_5(%arg0: i32) -> (i32, i32) {
    %c0_i32 = arith.constant 0 : i32
    %c0_i32_0 = arith.constant 0 : i32
    %c0_i32_1 = arith.constant 0 : i32
    return %c0_i32, %c0_i32_0 : i32, i32
  }
  func.func @transform_6(%arg0: i32) -> (i32, i32) {
    %c0_i32 = arith.constant 0 : i32
    %c0_i32_0 = arith.constant 0 : i32
    %c0_i32_1 = arith.constant 0 : i32
    return %c0_i32, %c0_i32_0 : i32, i32
  }
  func.func @transform_7(%arg0: i32) -> (i32, i32) {
    %c0_i32 = arith.constant 0 : i32
    %c0_i32_0 = arith.constant 0 : i32
    %c0_i32_1 = arith.constant 0 : i32
    return %c0_i32, %c0_i32_0 : i32, i32
  }
  func.func @transform_8(%arg0: i32) -> (i32, i32) {
    %c0_i32 = arith.constant 0 : i32
    %c0_i32_0 = arith.constant 0 : i32
    %c0_i32_1 = arith.constant 0 : i32
    return %c0_i32, %c0_i32_0 : i32, i32
  }
  func.func @transform_9(%arg0: i32) -> (i32, i32) {
    %c0_i32 = arith.constant 0 : i32
    %c0_i32_0 = arith.constant 0 : i32
    %c0_i32_1 = arith.constant 0 : i32
    return %c0_i32, %c0_i32_0 : i32, i32
  }
  func.func @transform_10(%arg0: i32) -> (i32, i32) {
    %c0_i32 = arith.constant 0 : i32
    %c0_i32_0 = arith.constant 0 : i32
    return %c0_i32, %arg0 : i32, i32
  }
}

</mosaic_0001>

<bundles_post_ra>
// kernel: tpu_custom_call.1
= control target key start
LH: loop header
LB: loop body
LE: loop exit
PB: predicated region body
PF: predicated region fallthrough
CT: control target
= control target key end

     0   :  { %vm65_vm0 = vcmask 1040384   ;;  %s720_s0 = inlined_call_operand.vmem [shape: f32[57,16], index: 0, kind: input, shape index: {}]   ;;  %s721_s1 = inlined_call_operand.vmem [shape: f32[15,16], index: 1, kind: input, shape index: {}]   ;;  %s722_s2 = inlined_call_operand.vmem [shape: s32[3,16], index: 2, kind: input, shape index: {}]   ;;  %s723_s3 = inlined_call_operand.vmem [shape: f32[15,57], index: 3, kind: input, shape index: {}]   ;;  %s724_s4 = inlined_call_operand.vmem [shape: f32[15,1], index: 4, kind: input, shape index: {}]   ;;  %s725_s5 = inlined_call_operand.vmem [shape: f32[15,57], index: 5, kind: input, shape index: {}]   ;;  %s726_s6 = inlined_call_operand.vmem [shape: f32[15,1], index: 6, kind: input, shape index: {}]   ;;  %s727_s7 = inlined_call_operand.vmem [shape: f32[15,1], index: 7, kind: input, shape index: {}]   ;;  %s728_s8 = inlined_call_operand.vmem [shape: f32[15,3], index: 8, kind: input, shape index: {}]   ;;  %s729_s9 = inlined_call_operand.vmem [shape: f32[15,15], index: 9, kind: input, shape index: {}]   ;;  %s730_s10 = inlined_call_operand.hbm [shape: f32[15,16], index: 10, kind: output, shape index: {}]  }
   0x1   :  { %v43_v0 = vld [vmem:[%s720_s0 + $0x38] sm:$0x1]  ;;  %v42_v1 = vld [vmem:[%s720_s0 + $0x30] sm:$0xff]  ;;  %v41_v2 = vld [vmem:[%s720_s0 + $0x28] sm:$0xff] }
   0x2   :  { %499 = vmatprep.subr.msk.mxu0 %vm65_vm0, %v43_v0  ;;  %518 = vmatprep.subr.msk.mxu1 %vm65_vm0, %v43_v0  ;;  %v40_v3 = vld [vmem:[%s720_s0 + $0x20] sm:$0xff]  ;;  %v39_v4 = vld [vmem:[%s720_s0 + $0x18] sm:$0xff] }
   0x3   :  { %500 = vmatpush3.msk.msra.mxu0 %vm65_vm0, %v43_v0  ;;  %519 = vmatpush3.msk.msra.mxu1 %vm65_vm0, %v43_v0 }
   0x4   :  { %501 = vmatprep.subr.mxu0 %v42_v1  ;;  %520 = vmatprep.subr.mxu1 %v42_v1 }
   0x5   :  { %502 = vmatpush3.msra.mxu0 %v42_v1  ;;  %521 = vmatpush3.msra.mxu1 %v42_v1 }
   0x6   :  { %503 = vmatprep.subr.mxu0 %v41_v2  ;;  %522 = vmatprep.subr.mxu1 %v41_v2 }
   0x7   :  { %504 = vmatpush3.msra.mxu0 %v41_v2  ;;  %523 = vmatpush3.msra.mxu1 %v41_v2 }
   0x8   :  { %505 = vmatprep.subr.mxu0 %v40_v3  ;;  %524 = vmatprep.subr.mxu1 %v40_v3 }
   0x9   :  { %15 = vsyncpa [#allocation3], 0  ;;  %506 = vmatpush3.msra.mxu0 %v40_v3  ;;  %525 = vmatpush3.msra.mxu1 %v40_v3  ;;  %v38_v5 = vld [vmem:[%s720_s0 + $0x10] sm:$0xff]  ;;  %v37_v6 = vld [vmem:[%s720_s0 + $0x8] sm:$0xff]  ;;  %vm58_vm1 = vcmask 465920   ;;  %vm250_vm2 = vcmask 1042432  }
   0xa   :  { %507 = vmatprep.subr.mxu0 %v39_v4  ;;  %526 = vmatprep.subr.mxu1 %v39_v4  ;;  %v36_v7 = vld [vmem:[%s720_s0] sm:$0xff]  ;;  %v45_v11 = vld [vmem:[%s723_s3 + $0x8] sm:$0x7f]  ;;  %vm243_vm3 = vcmask 23552   ;;  %v577_v18 = vmov 0   ;;  %vm347_vm4 = vcmask 121856  }
   0xb   :  { %508 = vmatpush3.msra.mxu0 %v39_v4  ;;  %527 = vmatpush3.msra.mxu1 %v39_v4  ;;  %v241_v8 = vld [vmem:[%s722_s2] sm:$0x7]  ;;  %v145_v12 = vld [vmem:[%s725_s5 + $0x8] sm:$0x7f]  ;;  %vm354_vm5 = vcmask 1046528   ;;  %s578_s13 = smov [#allocation2]  }
   0xc   :  { %509 = vmatprep.subr.mxu0 %v38_v5  ;;  %528 = vmatprep.subr.mxu1 %v38_v5  ;;  %v44_v9 = vld [vmem:[%s723_s3] sm:$0xff]  ;;  %v242_v13 = vcvt.s32.f32 %v241_v8  ;;  %v240_v16 = vld [vmem:[%s728_s8 + $0x8] sm:$0x7f]  ;;  %s448_s14 = sshll.u32 %s578_s13, 4  ;;  %vm441_vm8 = vcmask 129024   ;;  %vm439_vm9 = vcmask 130048   ;;  %s449_s14 = int_to_ptr.vmem [resolvable:$true] %s448_s14 }
   0xd   :  { %510 = vmatpush3.msra.mxu0 %v38_v5  ;;  %529 = vmatpush3.msra.mxu1 %v38_v5  ;;  %v144_v10 = vld [vmem:[%s725_s5] sm:$0xff]  ;;  %v147_v17 = vld [vmem:[%s726_s6 + $0x8] sm:$0x7f]  ;;  %s555_s15 = scalar_lea.vmem %s449_s14, 256  ;;  %p560_p1 = scmp.lt.s32.totalorder %s449_s14, %s449_s14 }
   0xe   :  { %511 = vmatprep.subr.mxu0 %v37_v6  ;;  %530 = vmatprep.subr.mxu1 %v37_v6  ;;  %v239_v14 = vld [vmem:[%s728_s8] sm:$0xff]  ;;  %v330_v20 = vld [vmem:[%s727_s7 + $0x8] sm:$0x7f]  ;;  %p556_p0 = scmp.ne.s32.totalorder %s449_s14, %s555_s15  ;;  %p561_p2 = scmp.lt.s32.totalorder %s555_s15, %s555_s15 }
   0xf   :  { %512 = vmatpush3.msra.mxu0 %v37_v6  ;;  %531 = vmatpush3.msra.mxu1 %v37_v6  ;;  %v146_v15 = vld [vmem:[%s726_s6] sm:$0xff]  ;;  %v47_v21 = vld [vmem:[%s724_s4 + $0x8] sm:$0x7f] }
  0x10   :  { %513 = vmatprep.subr.mxu0 %v36_v7  ;;  %532 = vmatprep.subr.mxu1 %v36_v7  ;;  %v329_v19 = vld [vmem:[%s727_s7] sm:$0xff]  ;;  %v346_v37 = vld [vmem:[%s729_s9 + $0x8] sm:$0x7f]  ;;  %p562_p3 = por %p561_p2, %p560_p1 }
  0x11   :  { %514 = vmatpush3.msra.mxu0 %v36_v7  ;;  %515 = vmatprep.mubr.msk.f32.mxu0 %vm58_vm1, %v44_v9  ;;  %v46_v22 = vld [vmem:[%s724_s4] sm:$0xff]  ;;  %v434_v42 = vld [vmem:[%s721_s1 + $0x8] sm:$0x7f] }
  0x12   :  { %533 = vmatpush3.msra.mxu1 %v36_v7  ;;  %534 = vmatprep.mubr.msk.f32.mxu1 %vm58_vm1, %v144_v10  ;;  %v345_v23 = vld [vmem:[%s729_s9] sm:$0xff]  ;;  %p563_p4 = pnand %p562_p3, %p556_p0 }
  0x13   :  { %516 = vmatmul.mubr.msk.f32.vlgmr.msra.gmra.mxu0 %vm58_vm1, %v45_v11  ;;  %535 = vmatmul.mubr.msk.f32.vlgmr.msra.gmra.mxu1 %vm58_vm1, %v145_v12  ;;  %v433_v46 = vld [vmem:[%s721_s1] sm:$0xff] }
  0x14   :  { %537 = vmatprep.subr.msk.mxu0 %vm250_vm2, %v242_v13  ;;  %539 = vmatprep.mubr.msk.f32.mxu0 %vm243_vm3, %v239_v14 }
  0x15   :  { %538 = vmatpush3.msk.msra.mxu0 %vm250_vm2, %v242_v13  ;;  %554 = vset.pattern.permute.xlu1 %v577_v18 }
  0x16   :  { %553 = vset.pattern.permute.xlu0 %v577_v18  ;;  %150 = vperm.xlu1 %554, %v146_v15  }
  0x17   :  { %540 = vmatmul.mubr.msk.f32.vlgmr.msra.gmra.mxu0 %vm243_vm3, %v240_v16  ;;  %155 = vperm.xlu0 %553, %v147_v17  }
  0x18   :  { %546 = vmatprep.mubr.msk.f32.mxu1 %vm347_vm4, %v345_v23 }
  0x1a   :  { %333 = vperm.xlu1 %554, %v329_v19  }
  0x1b   :  { %338 = vperm.xlu0 %553, %v330_v20  }
  0x1e   :  { %55 = vperm.xlu1 %554, %v47_v21  }
  0x1f   :  { %50 = vperm.xlu0 %553, %v46_v22  }
  0x91   :  { %v151_v25 = vpop.permute.xlu1 %150 }
  0x92   :  { %v156_v24 = vpop.permute.xlu0 %155 }
  0x95   :  { %v334_v33 = vpop.permute.xlu1 %333 }
  0x96   :  { %v339_v29 = vpop.permute.xlu0 %338 }
  0x99   :  { %v56_v38 = vpop.permute.xlu1 %55 }
  0x9a   :  { %v51_v40 = vpop.permute.xlu0 %50 }
  0xd3   :  { %v517_v26 = vpop.f32.mrf.mxu0  ;;  %v536_v27 = vpop.f32.mrf.mxu1 }
  0xd4   :  { %v236_v30 = vadd.f32 %v536_v27, %v156_v24  ;;  %v141_v39 = vadd.f32 %v517_v26, %v56_v38 }
  0xd5   :  { %v135_v28 = vpop.f32.mrf.mxu0  ;;  %v230_v31 = vpop.f32.mrf.mxu1 }
  0xd6   :  { %v231_v36 = vadd.f32 %v230_v31, %v151_v25  ;;  %v136_v43 = vadd.f32 %v135_v28, %v51_v40 }
  0xd7   :  { %v541_v32 = vpop.f32.mrf.mxu0 }
  0xd8   :  { %vm342_vm6 = vcmp.eq.f32.partialorder %v541_v32, %v339_v29 }
  0xd9   :  { %v344_v34 = vsel %vm342_vm6, %v236_v30, 0.0  ;;  %v320_v35 = vpop.f32.mrf.mxu0 }
  0xda   :  { %vm341_vm7 = vcmp.eq.f32.partialorder %v320_v35, %v334_v33  ;;  %542 = vmatprep.subr.msk.mxu1 %vm354_vm5, %v344_v34 }
  0xdb   :  { %543 = vmatpush3.msk.msra.mxu1 %vm354_vm5, %v344_v34 }
  0xdc   :  { %544 = vmatprep.subr.msk.mxu1 %vm341_vm7, %v231_v36 }
  0xdd   :  { %545 = vmatpush3.msk.msra.mxu1 %vm341_vm7, %v231_v36 }
  0xde   :  { %547 = vmatmul.mubr.msk.f32.vlgmr.msra.gmra.mxu1 %vm347_vm4, %v346_v37 }
 0x19e   :  { %v548_v41 = vpop.f32.mrf.mxu1 }
 0x19f   :  { %v436_v44 = vmul.f32 %v548_v41, %v141_v39 }
 0x1a0   :  { %v424_v45 = vpop.f32.mrf.mxu1 }
 0x1a1   :  { %v438_v47 = vadd.f32 %v436_v44, %v434_v42  ;;  %v435_v48 = vmul.f32 %v424_v45, %v136_v43 }
 0x1a3   :  { %442 = vst.msk [vmem:[#allocation2 + $0x8] sm:$0x7f] %vm441_vm8, %v438_v47  ;;  %v437_v49 = vadd.f32 %v435_v48, %v433_v46 }
 0x1a5   :  { %440 = vst.msk [vmem:[#allocation2] sm:$0xff] %vm439_vm9, %v437_v49 }
 0x1a6   :  { %566 = shalt.err (!%p563_p4)
}
 0x1a7   :  { %s579_s2 = smov 128   ;;  %s580_s16 = smov 8  }
 0x1a8   :  { %454 = dma.vmem_to_hbm [thread:$0]  %s449_s14, 256, %s730_s10, [#allocation3], %s579_s2, %s579_s2, %s580_s16  }
 0x1a9   :  { %575 = dma.done.wait [#allocation3], 256  }
 0x1aa   :  { %576 = vsyncadd [#allocation3], 4294967040 }
 0x1ab   :  { %458 = vsyncpa [#allocation3], 1 }

</bundles_post_ra>
